<compile_context>
chip_gen: v7x
topology: tpu7x:2x2x1
jax: 0.10.0
libtpu: 0.0.40
codegen_flags: <defaults>
</compile_context>

<pallas_src>
import jax
import jax.numpy as jnp
from jax.experimental import pallas as pl
from jax.experimental.pallas import tpu as pltpu

HIDDEN = 64
CONV_C = 16
OUT_DIM = 1
L_IN = 5                    # conv(k=2,pad=1) length = 6 -> pool(2) -> 3 -> fc1 sees 3*16 = 48
L_CONV = L_IN + 1           # 6
L_POOL = L_CONV // 2        # 3
FC1_IN = CONV_C * L_POOL    # 48
X_ROWS = 8                  # rows 0..4 = x, row 5 = 1.0 (conv-bias fold), rows 6..7 = 0 (alignment)
BN_EPS = 1e-5


def cnn_forward_kernel(x_ref, wconv_ref, w1t_ref, cp_ref, out_ref):
    """Fused CNNNet forward, batch on the lane axis.

    x_ref     : (8, TB)   rows 0..4 = x[:, 0..4], row 5 = 1.0, rows 6..7 = 0
    wconv_ref : (96, 8)   conv + bias as one matmul; rows 0..47 = even conv positions
                          (row t*16+c), rows 48..95 = odd positions -> pool = max of halves
    w1t_ref   : (64, 48)  BN-folded fc1 weight, transposed, time-major rows (t*16+c)
    cp_ref    : (64, 3)   col 0 = folded fc1 bias, col 1 = fc2 weight, col 2 row 0 = fc2 bias
    out_ref   : (1, TB)
    """
    # Conv1d(1->16, k=2, pad=1) + bias for all 6 positions in a single MXU dot.
    conv = jnp.dot(wconv_ref[...], x_ref[...],
                   preferred_element_type=jnp.float32)                    # (96, TB)

    # MaxPool1d(2) + ReLU (relu(max(a,b)) == max(relu(a), relu(b))).
    # Rows are already in the fc1-ready (t*16+c) order -> no concat / relayout.
    pooled = jnp.maximum(jnp.maximum(conv[:FC1_IN], conv[FC1_IN:]), 0.0)  # (48, TB)

    # fc1 with eval-mode BatchNorm folded in, then ReLU.
    h = jnp.dot(w1t_ref[...], pooled, preferred_element_type=jnp.float32)
    h = jnp.maximum(h + cp_ref[:, 0:1], 0.0)                              # (64, TB)

    # TODO(synk): Dropout(0.5) is identity in eval mode; training-mode stochastic masking not implemented.

    # fc2 (64 -> 1): VPU multiply + sublane (XLU) reduce -> lane-dense (1, TB) store.
    out = jnp.sum(h * cp_ref[:, 1:2], axis=0, keepdims=True) + cp_ref[0:1, 2:3]
    out_ref[...] = jnp.maximum(out, 0.0)


def _round_up(n, m):
    return (n + m - 1) // m * m


def _pick_tiling(B, max_batch_tile):
    """Near-equal 128-multiple lane blocks; >=2 blocks when possible (v7x megacore)."""
    b128 = _round_up(max(B, 1), 128)
    n_blocks = -(-b128 // max_batch_tile)
    if n_blocks == 1 and b128 >= 256:
        n_blocks = 2
    tb = _round_up(-(-b128 // n_blocks), 128)
    return tb, tb * n_blocks, n_blocks


def cnn_forward(x, params, *, max_batch_tile=4096):
    B = x.shape[0]
    TB, B_pad, n_blocks = _pick_tiling(B, max_batch_tile)

    # Batch-on-lanes input slab (8, B_pad).
    # TODO(synk): producing x feature-major upstream would remove this extra pad+transpose pass.
    x32 = x.astype(jnp.float32)
    x_slab = jnp.concatenate(
        [x32.T,
         jnp.ones((1, B), jnp.float32),
         jnp.zeros((X_ROWS - L_IN - 1, B), jnp.float32)], axis=0)          # (8, B)
    x_slab = jnp.pad(x_slab, ((0, 0), (0, B_pad - B)))                     # (8, B_pad)

    # Conv(+bias) as a (96, 8) matmul weight against the slab.
    # Row t*16+c (rows 0..47)  = conv output at even position p=2t.
    # Row 48+t*16+c (48..95)   = conv output at odd position  p=2t+1.
    # Padded-x position j+1 corresponds to slab column j; positions 0 / 6 are the
    # zero conv pads (no column); column 5 (ones) carries the conv bias.
    wc = params["wconv"].astype(jnp.float32)                               # (16, 2)
    bc = params["bconv"].astype(jnp.float32)                               # (16,)
    w_conv = jnp.zeros((2 * FC1_IN, X_ROWS), jnp.float32)
    for t in range(L_POOL):
        e0 = t * CONV_C
        o0 = FC1_IN + t * CONV_C
        # even position p = 2t reads padded x at [2t, 2t+1]
        if 2 * t - 1 >= 0:
            w_conv = w_conv.at[e0:e0 + CONV_C, 2 * t - 1].set(wc[:, 0])
        w_conv = w_conv.at[e0:e0 + CONV_C, 2 * t].set(wc[:, 1])
        w_conv = w_conv.at[e0:e0 + CONV_C, L_IN].set(bc)
        # odd position p = 2t+1 reads padded x at [2t+1, 2t+2]
        w_conv = w_conv.at[o0:o0 + CONV_C, 2 * t].set(wc[:, 0])
        if 2 * t + 1 <= L_IN - 1:
            w_conv = w_conv.at[o0:o0 + CONV_C, 2 * t + 1].set(wc[:, 1])
        w_conv = w_conv.at[o0:o0 + CONV_C, L_IN].set(bc)

    # Fold eval-mode BatchNorm into fc1.  PyTorch flatten index is c*3+t; regroup
    # rows to the kernel's time-major pooled order (t*16+c), then transpose.
    scale = params["gamma"] * jax.lax.rsqrt(params["running_var"] + BN_EPS)
    w1_re = (params["w1"].reshape(CONV_C, L_POOL, HIDDEN)
             .transpose(1, 0, 2).reshape(FC1_IN, HIDDEN))
    w1t = (w1_re * scale[None, :]).T.astype(jnp.float32)                   # (64, 48)
    b1_eff = (params["b1"] - params["running_mean"]) * scale + params["beta"]

    # Remaining small params packed into one (64, 3) slab.
    cp = jnp.zeros((HIDDEN, 3), jnp.float32)
    cp = cp.at[:, 0].set(b1_eff)
    cp = cp.at[:, 1].set(params["w2"][:, 0])
    cp = cp.at[0, 2].set(params["b2"][0])

    out_t = pl.pallas_call(
        cnn_forward_kernel,
        out_shape=jax.ShapeDtypeStruct((1, B_pad), jnp.float32),
        grid=(n_blocks,),
        in_specs=[
            pl.BlockSpec((X_ROWS, TB), lambda i: (0, i)),                  # x tile per grid step
            pl.BlockSpec((2 * FC1_IN, X_ROWS), lambda i: (0, 0)),          # conv matmul weight, resident
            pl.BlockSpec((HIDDEN, FC1_IN), lambda i: (0, 0)),              # BN-folded fc1 weight, resident
            pl.BlockSpec((HIDDEN, 3), lambda i: (0, 0)),                   # packed biases / fc2, resident
        ],
        out_specs=pl.BlockSpec((1, TB), lambda i: (0, i)),
        compiler_params=pltpu.CompilerParams(
            dimension_semantics=("parallel",),
            vmem_limit_bytes=32 * 1024 * 1024),
    )(x_slab, w_conv, w1t, cp)
    return out_t[:, :B].T                                                  # (B, 1)


def reference_forward(x, params):
    """Pure-JAX replica of the PyTorch forward (eval mode)."""
    xp = jnp.pad(x, ((0, 0), (1, 1)))
    conv = (params["wconv"][None, :, 0, None] * xp[:, None, 0:6]
            + params["wconv"][None, :, 1, None] * xp[:, None, 1:7]
            + params["bconv"][None, :, None])                              # (B, 16, 6)
    conv = jnp.maximum(conv, 0.0)
    pooled = jnp.maximum(conv[:, :, 0::2], conv[:, :, 1::2])               # (B, 16, 3)
    flat = pooled.reshape(x.shape[0], -1)                                  # (B, 48), index c*3+t
    h = flat @ params["w1"] + params["b1"]
    h = ((h - params["running_mean"])
         / jnp.sqrt(params["running_var"] + BN_EPS)
         * params["gamma"] + params["beta"])
    h = jnp.maximum(h, 0.0)
    out = h @ params["w2"] + params["b2"]
    return jnp.maximum(out, 0.0)


def init_params(key):
    ks = jax.random.split(key, 10)
    p = {}
    p["wconv"] = 0.5 * jax.random.normal(ks[0], (CONV_C, 2), jnp.float32)  # Conv1d weight (C_out, k), C_in=1
    p["bconv"] = 0.1 * jax.random.normal(ks[1], (CONV_C,), jnp.float32)
    p["w1"] = jax.random.normal(ks[2], (FC1_IN, HIDDEN), jnp.float32) / jnp.sqrt(48.0)
    p["b1"] = 0.1 * jax.random.normal(ks[3], (HIDDEN,), jnp.float32)
    p["gamma"] = 1.0 + 0.1 * jax.random.normal(ks[4], (HIDDEN,), jnp.float32)
    p["beta"] = 0.05 * jax.random.normal(ks[5], (HIDDEN,), jnp.float32)
    p["running_mean"] = 0.1 * jax.random.normal(ks[6], (HIDDEN,), jnp.float32)
    p["running_var"] = 0.5 + 0.5 * jnp.abs(jax.random.normal(ks[7], (HIDDEN,), jnp.float32))
    p["w2"] = jax.random.normal(ks[8], (HIDDEN, OUT_DIM), jnp.float32) / jnp.sqrt(64.0)
    p["b2"] = 0.1 * jax.random.normal(ks[9], (OUT_DIM,), jnp.float32)
    return p


if __name__ == "__main__":
    key = jax.random.PRNGKey(0)
    kx, kp = jax.random.split(key)
    params = init_params(kp)

    for B in (8, 3):   # includes a non-multiple-of-8 batch to exercise padding
        x = jax.random.normal(jax.random.fold_in(kx, B), (B, L_IN), jnp.float32)
        out = jax.block_until_ready(cnn_forward(x, params))
        ref = reference_forward(x, params)
        assert out.shape == (B, OUT_DIM), out.shape
        if not jnp.allclose(out, ref, atol=1e-3, rtol=1e-3):
            raise AssertionError(f"kernel/reference mismatch (B={B}):\n{out}\nvs\n{ref}")
    print("KERNEL_OK")
</pallas_src>

<mosaic_0001>
module attributes {stable_mosaic.version = 11 : i64} {
  func.func @cnn_forward_kernel(%arg0: i32, %arg1: memref<8x128xf32, #tpu.memory_space<vmem>>, %arg2: memref<96x8xf32, #tpu.memory_space<vmem>>, %arg3: memref<64x48xf32, #tpu.memory_space<vmem>>, %arg4: memref<64x3xf32, #tpu.memory_space<vmem>>, %arg5: memref<1x128xf32, #tpu.memory_space<vmem>>) attributes {dimension_semantics = [#tpu.dimension_semantics<parallel>], iteration_bounds = array<i64: 1>, scalar_prefetch = 0 : i64, scratch_operands = 0 : i64, tpu.core_type = #tpu.core_type<tc>, window_params = [{transform_indices = @transform_0, window_bounds = array<i64: 8, 128>}, {pipeline_mode = #tpu.pipeline_mode<synchronous>, transform_indices = @transform_1, window_bounds = array<i64: 96, 8>}, {pipeline_mode = #tpu.pipeline_mode<synchronous>, transform_indices = @transform_2, window_bounds = array<i64: 64, 48>}, {pipeline_mode = #tpu.pipeline_mode<synchronous>, transform_indices = @transform_3, window_bounds = array<i64: 64, 3>}, {transform_indices = @transform_4, window_bounds = array<i64: 1, 128>}]} {
    %c0 = arith.constant 0 : index
    %c0_0 = arith.constant 0 : index
    %0 = vector.load %arg2[%c0, %c0_0] : memref<96x8xf32, #tpu.memory_space<vmem>>, vector<96x8xf32>
    %c0_1 = arith.constant 0 : index
    %c0_2 = arith.constant 0 : index
    %1 = vector.load %arg1[%c0_1, %c0_2] : memref<8x128xf32, #tpu.memory_space<vmem>>, vector<8x128xf32>
    %cst = arith.constant dense<0.000000e+00> : vector<96x128xf32>
    %2 = tpu.matmul %0, %1, %cst {dimension_numbers = #tpu.dot_dimension_numbers<[1], [0], [0], [1], [0, 0, 1, 1], [], []>} : vector<96x8xf32>, vector<8x128xf32>, vector<96x128xf32> -> vector<96x128xf32>
    %3 = vector.extract_strided_slice %2 {offsets = [0, 0], sizes = [48, 128], strides = [1, 1]} : vector<96x128xf32> to vector<48x128xf32>
    %4 = vector.extract_strided_slice %2 {offsets = [48, 0], sizes = [48, 128], strides = [1, 1]} : vector<96x128xf32> to vector<48x128xf32>
    %5 = arith.maximumf %3, %4 : vector<48x128xf32>
    %cst_3 = arith.constant 0.000000e+00 : f32
    %6 = vector.broadcast %cst_3 : f32 to vector<48x128xf32>
    %7 = arith.maximumf %5, %6 : vector<48x128xf32>
    %c0_4 = arith.constant 0 : index
    %c0_5 = arith.constant 0 : index
    %8 = vector.load %arg3[%c0_4, %c0_5] : memref<64x48xf32, #tpu.memory_space<vmem>>, vector<64x48xf32>
    %cst_6 = arith.constant dense<0.000000e+00> : vector<64x128xf32>
    %9 = tpu.matmul %8, %7, %cst_6 {dimension_numbers = #tpu.dot_dimension_numbers<[1], [0], [0], [1], [0, 0, 1, 1], [], []>} : vector<64x48xf32>, vector<48x128xf32>, vector<64x128xf32> -> vector<64x128xf32>
    %c0_7 = arith.constant 0 : index
    %c0_8 = arith.constant 0 : index
    %10 = vector.load %arg4[%c0_7, %c0_8] : memref<64x3xf32, #tpu.memory_space<vmem>>, vector<64x1xf32>
    %11 = vector.broadcast %10 : vector<64x1xf32> to vector<64x128xf32>
    %12 = arith.addf %9, %11 : vector<64x128xf32>
    %cst_9 = arith.constant 0.000000e+00 : f32
    %13 = vector.broadcast %cst_9 : f32 to vector<64x128xf32>
    %14 = arith.maximumf %12, %13 : vector<64x128xf32>
    %c0_10 = arith.constant 0 : index
    %c1 = arith.constant 1 : index
    %15 = vector.load %arg4[%c0_10, %c1] : memref<64x3xf32, #tpu.memory_space<vmem>>, vector<64x1xf32>
    %16 = vector.broadcast %15 : vector<64x1xf32> to vector<64x128xf32>
    %17 = arith.mulf %14, %16 : vector<64x128xf32>
    %cst_11 = arith.constant dense<0.000000e+00> : vector<128xf32>
    %18 = vector.multi_reduction <add>, %17, %cst_11 [0] : vector<64x128xf32> to vector<128xf32>
    %19 = vector.shape_cast %18 : vector<128xf32> to vector<1x128xf32>
    %c0_12 = arith.constant 0 : index
    %c2 = arith.constant 2 : index
    %20 = vector.load %arg4[%c0_12, %c2] : memref<64x3xf32, #tpu.memory_space<vmem>>, vector<1x1xf32>
    %21 = vector.broadcast %20 : vector<1x1xf32> to vector<1x128xf32>
    %22 = arith.addf %19, %21 : vector<1x128xf32>
    %cst_13 = arith.constant 0.000000e+00 : f32
    %23 = vector.broadcast %cst_13 : f32 to vector<1x128xf32>
    %24 = arith.maximumf %22, %23 : vector<1x128xf32>
    %c0_14 = arith.constant 0 : index
    %c0_15 = arith.constant 0 : index
    %25 = vector.load %arg5[%c0_14, %c0_15] : memref<1x128xf32, #tpu.memory_space<vmem>>, vector<1x128xf32>
    tpu.vector_store %arg5[%c0_14, %c0_15], %24 {strides = array<i32>} : memref<1x128xf32, #tpu.memory_space<vmem>>, vector<1x128xf32>,
    return
  }
  func.func @transform_0(%arg0: i32) -> (i32, i32) {
    %c0_i32 = arith.constant 0 : i32
    %c0_i32_0 = arith.constant 0 : i32
    return %c0_i32, %arg0 : i32, i32
  }
  func.func @transform_1(%arg0: i32) -> (i32, i32) {
    %c0_i32 = arith.constant 0 : i32
    %c0_i32_0 = arith.constant 0 : i32
    %c0_i32_1 = arith.constant 0 : i32
    return %c0_i32, %c0_i32_0 : i32, i32
  }
  func.func @transform_2(%arg0: i32) -> (i32, i32) {
    %c0_i32 = arith.constant 0 : i32
    %c0_i32_0 = arith.constant 0 : i32
    %c0_i32_1 = arith.constant 0 : i32
    return %c0_i32, %c0_i32_0 : i32, i32
  }
  func.func @transform_3(%arg0: i32) -> (i32, i32) {
    %c0_i32 = arith.constant 0 : i32
    %c0_i32_0 = arith.constant 0 : i32
    %c0_i32_1 = arith.constant 0 : i32
    return %c0_i32, %c0_i32_0 : i32, i32
  }
  func.func @transform_4(%arg0: i32) -> (i32, i32) {
    %c0_i32 = arith.constant 0 : i32
    %c0_i32_0 = arith.constant 0 : i32
    return %c0_i32, %arg0 : i32, i32
  }
}

</mosaic_0001>

<bundles_post_ra>
// kernel: tpu_custom_call.1
= control target key start
LH: loop header
LB: loop body
LE: loop exit
PB: predicated region body
PF: predicated region fallthrough
CT: control target
= control target key end

     0   :  { %vm31_vm0 = vcmask 64512   ;;  %s765_s0 = inlined_call_operand.vmem [shape: f32[8,128], index: 0, kind: input, shape index: {}]   ;;  %s766_s1 = inlined_call_operand.vmem [shape: f32[96,8], index: 1, kind: input, shape index: {}]   ;;  %s767_s2 = inlined_call_operand.vmem [shape: f32[64,48], index: 2, kind: input, shape index: {}]   ;;  %s768_s3 = inlined_call_operand.vmem [shape: f32[64,3], index: 3, kind: input, shape index: {}]   ;;  %s769_s4 = inlined_call_operand.hbm [shape: f32[1,128], index: 4, kind: output, shape index: {}]  }
   0x1   :  { %v30_v0 = vld [vmem:[%s765_s0] sm:$0xff]  ;;  %v19_v2 = vld [vmem:[%s766_s1 + $0x8] sm:$0xff]  ;;  %v20_v3 = vld [vmem:[%s766_s1 + $0x10] sm:$0xff] }
   0x2   :  { %v18_v1 = vld [vmem:[%s766_s1] sm:$0xff]  ;;  %522 = vmatprep.subr.mxu0 %v30_v0  ;;  %v21_v4 = vld [vmem:[%s766_s1 + $0x18] sm:$0xff] }
   0x3   :  { %524 = vmatprep.mubr.msk.f32.mxu0 %vm31_vm0, %v18_v1  ;;  %523 = vmatpush3.msra.mxu0 %v30_v0 }
   0x4   :  { %525 = vmatmul.mubr.msk.f32.vlgmr.msra.gmra.mrb[0].mxu0 %vm31_vm0, %v19_v2 }
   0x5   :  { %527 = vmatprep.mubr.msk.f32.mxu0 %vm31_vm0, %v20_v3 }
   0x6   :  { %9 = vsyncpa [#allocation3], 0  ;;  %v22_v5 = vld [vmem:[%s766_s1 + $0x20] sm:$0xff]  ;;  %v23_v6 = vld [vmem:[%s766_s1 + $0x28] sm:$0xff]  ;;  %vm261_vm1 = vcmask 392192   ;;  %v614_v16 = vmov 0  }
   0x7   :  { %v24_v7 = vld [vmem:[%s766_s1 + $0x30] sm:$0xff]  ;;  %v25_v8 = vld [vmem:[%s766_s1 + $0x38] sm:$0xff]  ;;  %v26_v9 = vld [vmem:[%s766_s1 + $0x40] sm:$0xff]  ;;  %582 = vset.pattern.permute.xlu0 %v614_v16  ;;  %583 = vset.pattern.permute.xlu1 %v614_v16  ;;  %v615_v19 = vmov 1   ;;  %v616_v25 = vmov 2  }
   0x8   :  { %528 = vmatmul.mubr.msk.f32.gmra.mrb[2].mxu0 %vm31_vm0, %v21_v4  ;;  %v27_v10 = vld [vmem:[%s766_s1 + $0x48] sm:$0xff]  ;;  %v28_v11 = vld [vmem:[%s766_s1 + $0x50] sm:$0xff]  ;;  %v29_v12 = vld [vmem:[%s766_s1 + $0x58] sm:$0xff] }
   0x9   :  { %530 = vmatprep.mubr.msk.f32.mxu0 %vm31_vm0, %v22_v5  ;;  %v205_v13 = vld [vmem:[%s767_s2] sm:$0xff]  ;;  %v215_v15 = vld [vmem:[%s768_s3 + $0x10] sm:$0xff]  ;;  %v214_v17 = vld [vmem:[%s768_s3 + $0x8] sm:$0xff] }
   0xa   :  { %554 = vmatprep.mubr.msk.f32.mxu1 %vm261_vm1, %v205_v13  ;;  %v213_v14 = vld [vmem:[%s768_s3] sm:$0xff]  ;;  %233 = vperm.xlu1 %583, %v215_v15   ;;  %v216_v18 = vld [vmem:[%s768_s3 + $0x18] sm:$0xff]  ;;  %v218_v21 = vld [vmem:[%s768_s3 + $0x28] sm:$0xff] }
   0xb   :  { %223 = vperm.xlu0 %582, %v213_v14   ;;  %v217_v20 = vld [vmem:[%s768_s3 + $0x20] sm:$0xff]  ;;  %v219_v22 = vld [vmem:[%s768_s3 + $0x30] sm:$0xff]  ;;  %v220_v23 = vld [vmem:[%s768_s3 + $0x38] sm:$0xff] }
   0xc   :  { %531 = vmatmul.mubr.msk.f32.gmra.mrb[4].mxu0 %vm31_vm0, %v23_v6  ;;  %v452_v24 = vld [vmem:[%s768_s3] sm:$0x1]  ;;  %v206_v53 = vld [vmem:[%s767_s2 + $0x8] sm:$0xff]  ;;  %v207_v54 = vld [vmem:[%s767_s2 + $0x10] sm:$0xff] }
   0xd   :  { %533 = vmatprep.mubr.msk.f32.mxu0 %vm31_vm0, %v24_v7  ;;  %v208_v55 = vld [vmem:[%s767_s2 + $0x18] sm:$0xff]  ;;  %v209_v56 = vld [vmem:[%s767_s2 + $0x20] sm:$0xff]  ;;  %v210_v57 = vld [vmem:[%s767_s2 + $0x28] sm:$0xff] }
   0xe   :  { %238 = vperm.xlu1 %583, %v216_v18   ;;  %v211_v58 = vld [vmem:[%s767_s2 + $0x30] sm:$0xff]  ;;  %v212_v59 = vld [vmem:[%s767_s2 + $0x38] sm:$0xff]  ;;  %s617_s2 = smov [#allocation2]  }
   0xf   :  { %228 = vperm.xlu0 %582, %v214_v17   ;;  %s467_s19 = sshll.u32 %s617_s2, 4  ;;  %s468_s19 = int_to_ptr.vmem [resolvable:$true] %s467_s19 }
  0x10   :  { %534 = vmatmul.mubr.msk.f32.gmra.mrb[6].mxu0 %vm31_vm0, %v25_v8  ;;  %s590_s1 = scalar_lea.vmem %s468_s19, 16  ;;  %s594_s20 = scalar_lea.vmem %s468_s19, 32 }
  0x11   :  { %536 = vmatprep.mubr.msk.f32.mxu0 %vm31_vm0, %v26_v9  ;;  %p591_p0 = scmp.ne.s32.totalorder %s468_s19, %s590_s1  ;;  %p595_p1 = scmp.lt.s32.totalorder %s468_s19, %s468_s19 }
  0x12   :  { %585 = vset.pattern.permute.xlu1 %v615_v19  ;;  %p596_p2 = scmp.lt.s32.totalorder %s594_s20, %s590_s1 }
  0x13   :  { %584 = vset.pattern.permute.xlu0 %v615_v19  ;;  %404 = vperm.xlu1 %585, %v214_v17  }
  0x14   :  { %537 = vmatmul.mubr.msk.f32.gmra.mrb[8].mxu0 %vm31_vm0, %v27_v10  ;;  %400 = vperm.xlu0 %584, %v213_v14   ;;  %p597_p3 = por %p596_p2, %p595_p1 }
  0x15   :  { %539 = vmatprep.mubr.msk.f32.mxu0 %vm31_vm0, %v28_v11 }
  0x16   :  { %p598_p4 = pnand %p597_p3, %p591_p0 }
  0x17   :  { %586 = vset.pattern.permute.xlu1 %v614_v16 }
  0x18   :  { %540 = vmatmul.mubr.msk.f32.gmra.mrb[10].mxu0 %vm31_vm0, %v29_v12  ;;  %408 = vperm.xlu0 %584, %v215_v15  }
  0x19   :  { %243 = vperm.xlu1 %586, %v217_v20  }
  0x1c   :  { %412 = vperm.xlu0 %584, %v216_v18  }
  0x1d   :  { %248 = vperm.xlu1 %586, %v218_v21  }
  0x20   :  { %416 = vperm.xlu0 %584, %v217_v20  }
  0x21   :  { %253 = vperm.xlu1 %586, %v219_v22  }
  0x24   :  { %420 = vperm.xlu0 %584, %v218_v21  }
  0x25   :  { %258 = vperm.xlu1 %586, %v220_v23  }
  0x28   :  { %428 = vperm.xlu0 %584, %v220_v23  }
  0x29   :  { %587 = vset.pattern.permute.xlu1 %v615_v19 }
  0x2a   :  { %424 = vperm.xlu1 %587, %v219_v22  }
  0x2c   :  { %589 = vset.pattern.permute.xlu0 %v616_v25 }
  0x2e   :  { %588 = vset.pattern.permute.xlu1 %v616_v25 }
  0x2f   :  { %455 = vperm.xlu1 %588, %v452_v24  }
  0x89   :  { %v234_v60 = vpop.permute.xlu1 %233 }
  0x8a   :  { %v224_v61 = vpop.permute.xlu0 %223 }
  0x8d   :  { %v239_v62 = vpop.permute.xlu1 %238 }
  0x8e   :  { %v229_v63 = vpop.permute.xlu0 %228 }
  0x92   :  { %v405_v0 = vpop.permute.xlu1 %404 }
  0x93   :  { %v401_v1 = vpop.permute.xlu0 %400 }
  0x97   :  { %v409_v3 = vpop.permute.xlu0 %408 }
  0x98   :  { %v244_v2 = vpop.permute.xlu1 %243 }
  0x9b   :  { %v413_v6 = vpop.permute.xlu0 %412 }
  0x9c   :  { %v249_v4 = vpop.permute.xlu1 %248 }
  0x9f   :  { %v417_v19 = vpop.permute.xlu0 %416 }
  0xa0   :  { %v254_v13 = vpop.permute.xlu1 %253 }
  0xd7   :  { %v526_v26 = vpop.f32.mrb[0].mxu0 }
  0xd8   :  { %v134_v27 = vpop.f32.mrb[1].mxu0 }
  0xdb   :  { %v529_v28 = vpop.f32.mrb[2].mxu0 }
  0xdc   :  { %v144_v29 = vpop.f32.mrb[3].mxu0 }
  0xdf   :  { %v532_v30 = vpop.f32.mrb[4].mxu0 }
  0xe0   :  { %v154_v31 = vpop.f32.mrb[5].mxu0 }
  0xe3   :  { %v535_v32 = vpop.f32.mrb[6].mxu0 }
  0xe4   :  { %v194_v33 = vmax.f32 %v526_v26, %v535_v32  ;;  %v164_v34 = vpop.f32.mrb[7].mxu0 }
  0xe5   :  { %v193_v35 = vmax.f32 %v134_v27, %v164_v34  ;;  %v421_v34 = vpop.permute.xlu0 %420 }
  0xe6   :  { %v200_v36 = vmax.f32 %v194_v33, 0.0 }
  0xe7   :  { %v199_v37 = vmax.f32 %v193_v35, 0.0  ;;  %v538_v38 = vpop.f32.mrb[8].mxu0 }
  0xe8   :  { %v196_v39 = vmax.f32 %v529_v28, %v538_v38  ;;  %v174_v40 = vpop.f32.mrb[9].mxu0  ;;  %v259_v28 = vpop.permute.xlu1 %258 }
  0xe9   :  { %v195_v41 = vmax.f32 %v144_v29, %v174_v40  ;;  %v566_v42 = vpack.c.bf16 %v200_v36, %v199_v37 }
  0xea   :  { %v202_v43 = vmax.f32 %v196_v39, 0.0 }
  0xeb   :  { %v201_v44 = vmax.f32 %v195_v41, 0.0  ;;  %v541_v45 = vpop.f32.mrb[10].mxu0  ;;  %567 = vmatprep.subr.bf16.mxu1 %v566_v42 }
  0xec   :  { %v198_v46 = vmax.f32 %v532_v30, %v541_v45  ;;  %v184_v47 = vpop.f32.mrb[11].mxu0  ;;  %569 = vmatpush3.bf16.msra.mxu1 %v566_v42  ;;  %v425_v40 = vpop.permute.xlu1 %424 }
  0xed   :  { %v570_v48 = vpack.c.bf16 %v202_v43, %v201_v44  ;;  %v197_v49 = vmax.f32 %v154_v31, %v184_v47  ;;  %v429_v47 = vpop.permute.xlu0 %428 }
  0xee   :  { %v204_v50 = vmax.f32 %v198_v46, 0.0 }
  0xef   :  { %v203_v51 = vmax.f32 %v197_v49, 0.0  ;;  %571 = vmatprep.subr.bf16.mxu1 %v570_v48 }
  0xf0   :  { %573 = vmatpush3.bf16.msra.mxu1 %v570_v48 }
  0xf1   :  { %v574_v52 = vpack.c.bf16 %v204_v50, %v203_v51 }
  0xf3   :  { %575 = vmatprep.subr.bf16.mxu1 %v574_v52 }
  0xf4   :  { %577 = vmatpush3.bf16.msra.mxu1 %v574_v52 }
  0xf7   :  { %555 = vmatmul.mubr.msk.f32.vlgmr.msra.gmra.mrb[0].mxu1 %vm261_vm1, %v206_v53 }
  0xf8   :  { %557 = vmatprep.mubr.msk.f32.mxu1 %vm261_vm1, %v207_v54 }
  0xfb   :  { %558 = vmatmul.mubr.msk.f32.gmra.mrb[2].mxu1 %vm261_vm1, %v208_v55 }
  0xfc   :  { %560 = vmatprep.mubr.msk.f32.mxu1 %vm261_vm1, %v209_v56  ;;  %v456_v56 = vpop.permute.xlu1 %455 }
  0xff   :  { %561 = vmatmul.mubr.msk.f32.gmra.mrb[4].mxu1 %vm261_vm1, %v210_v57 }
 0x100   :  { %563 = vmatprep.mubr.msk.f32.mxu1 %vm261_vm1, %v211_v58 }
 0x103   :  { %564 = vmatmul.mubr.msk.f32.gmra.mrb[6].mxu1 %vm261_vm1, %v212_v59 }
 0x1ca   :  { %v556_v5 = vpop.f32.mrb[0].mxu1 }
 0x1cb   :  { %v358_v7 = vadd.f32 %v556_v5, %v229_v63  ;;  %v352_v8 = vpop.f32.mrb[1].mxu1 }
 0x1cc   :  { %v353_v9 = vadd.f32 %v352_v8, %v224_v61 }
 0x1cd   :  { %v392_v10 = vmax.f32 %v358_v7, 0.0 }
 0x1ce   :  { %v391_v11 = vmax.f32 %v353_v9, 0.0  ;;  %v559_v12 = vpop.f32.mrb[2].mxu1 }
 0x1cf   :  { %v432_v14 = vmul.f32 %v405_v0, %v392_v10  ;;  %v368_v15 = vadd.f32 %v559_v12, %v239_v62  ;;  %v362_v16 = vpop.f32.mrb[3].mxu1 }
 0x1d0   :  { %v431_v17 = vmul.f32 %v401_v1, %v391_v11  ;;  %v363_v18 = vadd.f32 %v362_v16, %v234_v60 }
 0x1d1   :  { %v394_v21 = vmax.f32 %v368_v15, 0.0 }
 0x1d2   :  { %v439_v20 = vadd.f32 %v432_v14, %v431_v17  ;;  %v393_v22 = vmax.f32 %v363_v18, 0.0  ;;  %v562_v23 = vpop.f32.mrb[4].mxu1 }
 0x1d3   :  { %v378_v24 = vadd.f32 %v562_v23, %v249_v4  ;;  %v372_v25 = vpop.f32.mrb[5].mxu1  ;;  %v434_v29 = vmul.f32 %v413_v6, %v394_v21 }
 0x1d4   :  { %v433_v26 = vmul.f32 %v409_v3, %v393_v22  ;;  %v373_v27 = vadd.f32 %v372_v25, %v244_v2 }
 0x1d5   :  { %v396_v31 = vmax.f32 %v378_v24, 0.0 }
 0x1d6   :  { %v440_v30 = vadd.f32 %v439_v20, %v433_v26  ;;  %v395_v32 = vmax.f32 %v373_v27, 0.0  ;;  %v565_v33 = vpop.f32.mrb[6].mxu1 }
 0x1d7   :  { %v388_v35 = vadd.f32 %v565_v33, %v259_v28  ;;  %v382_v36 = vpop.f32.mrb[7].mxu1  ;;  %v436_v41 = vmul.f32 %v421_v34, %v396_v31 }
 0x1d8   :  { %v435_v37 = vmul.f32 %v417_v19, %v395_v32  ;;  %v441_v38 = vadd.f32 %v440_v30, %v434_v29  ;;  %v383_v39 = vadd.f32 %v382_v36, %v254_v13 }
 0x1d9   :  { %v398_v43 = vmax.f32 %v388_v35, 0.0 }
 0x1da   :  { %v442_v42 = vadd.f32 %v441_v38, %v435_v37  ;;  %v397_v44 = vmax.f32 %v383_v39, 0.0 }
 0x1db   :  { %v438_v48 = vmul.f32 %v429_v47, %v398_v43 }
 0x1dc   :  { %v437_v45 = vmul.f32 %v425_v40, %v397_v44  ;;  %v443_v46 = vadd.f32 %v442_v42, %v436_v41 }
 0x1de   :  { %v444_v49 = vadd.f32 %v443_v46, %v437_v45 }
 0x1e0   :  { %v445_v50 = vadd.f32 %v444_v49, %v438_v48 }
 0x1e2   :  { %v446_v51 = vrot.slane %v445_v50, 4 }
 0x1e4   :  { %v447_v52 = vadd.f32 %v446_v51, %v445_v50 }
 0x1e6   :  { %v448_v53 = vrot.slane %v447_v52, 2 }
 0x1e8   :  { %v449_v54 = vadd.f32 %v448_v53, %v447_v52 }
 0x1ea   :  { %v450_v55 = vrot.slane %v449_v54, 1 }
 0x1ec   :  { %v451_v57 = vadd.f32 %v450_v55, %v449_v54 }
 0x1ee   :  { %v458_v58 = vadd.f32 %v456_v56, %v451_v57 }
 0x1f0   :  { %v459_v59 = vmax.f32 %v458_v58, 0.0 }
 0x1f2   :  { %460 = vst [vmem:[#allocation2] sm:$0x1] %v459_v59 }
 0x1f3   :  { %601 = shalt.err (!%p598_p4)
}
 0x1f4   :  { %s602_s0 = scalar_lea.hbm %s769_s4, 16 }
 0x1f5   :  { %p603_p5 = scmp.ne.s32.totalorder %s769_s4, %s602_s0  ;;  %p606_p6 = scmp.lt.u32.totalorder %s602_s0, %s769_s4 }
 0x1f7   :  { %p608_p7 = pnand %p606_p6, %p603_p5 }
 0x1f9   :  { %611 = shalt.err (!%p608_p7)
}
 0x1fa   :  { %470 = dma.vmem_to_hbm [thread:$0]  %s468_s19, 16, %s769_s4, [#allocation3]  }
 0x1fb   :  { %612 = dma.done.wait [#allocation3], 16  }
 0x1fc   :  { %613 = vsyncadd [#allocation3], 4294967280 }
 0x1fd   :  { %474 = vsyncpa [#allocation3], 1 }

</bundles_post_ra>
